<compile_context>
chip_gen: v6e
topology: v6e:2x2x1
jax: 0.10.0
libtpu: 0.0.40
codegen_flags: <defaults>
</compile_context>

<pallas_src>
import numpy as np
import jax
import jax.numpy as jnp
from jax import lax
from jax.experimental import pallas as pl
from jax.experimental.pallas import tpu as pltpu


NWAY_PAD = 128   # lane-dense classifier output width (sliced back to n_way outside)
MAX_NB = 8       # images per grid step (keeps the row slab at HP*NB sublanes)


# ------------------------- trace-time weight folding -------------------------

def _banded_conv_weight(w_conv, W, parity):
    """OIHW conv weight -> per-dh banded matmul weights producing only the
    even-w (parity=0) or odd-w (parity=1) conv output columns.

    Returns [3, (W+2)*Cin, Cout*(W//2)] with
      out[dh, wp*Cin + c, o*(W//2) + w'] = w_conv[o, c, dh, dw]
    where wp == 2*w' + parity + dw (zero elsewhere).
    """
    Cout, Cin, KH, KW = w_conv.shape
    WP = W // 2
    sel = np.zeros((KW, WP, W + 2), np.float32)
    for dw in range(KW):
        for wq in range(WP):
            sel[dw, wq, 2 * wq + parity + dw] = 1.0
    sel = jnp.asarray(sel)
    wb = jnp.einsum("dqP,ocDd->DPcoq", sel, w_conv)      # [3, W+2, Cin, Cout, WP]
    return wb.reshape(KH, (W + 2) * Cin, Cout * WP)


def _remap_classifier(w_cls, Cout, HP, WP):
    """PyTorch Linear weight [n_way, Cout*HP*WP] (NCHW-flatten feature order)
    -> [HP, Cout*WP, NWAY_PAD] matching the kernel's pooled layout
    (rows = h', lanes = o*WP + w'), zero-padded to a lane-dense 128 output."""
    n_way = w_cls.shape[0]
    t = w_cls.reshape(n_way, Cout, HP, WP)               # [j, o, h', w']
    t = jnp.transpose(t, (2, 1, 3, 0))                   # [h', o, w', j]
    t = t.reshape(HP, Cout * WP, n_way)
    return jnp.pad(t, ((0, 0), (0, 0), (0, NWAY_PAD - n_way)))


# ------------------------------ fused forward --------------------------------

def maml_forward(x_nchw, params):
    """MAML.forward: scores = classifier(encoder(x)).  Returns [N, n_way]."""
    w_conv = params["w_conv"]          # [Cout, Cin, 3, 3] (PyTorch OIHW)
    b_conv = params["b_conv"]          # [Cout]
    w_cls = params["w_cls"]            # [n_way, Cout*(H/2)*(W/2)]
    b_cls = params["b_cls"]            # [n_way]

    N, Cin, H, W = x_nchw.shape
    Cout = w_conv.shape[0]
    n_way = w_cls.shape[0]
    HP, WP = H // 2, W // 2
    KIN = (W + 2) * Cin                # lane width of one padded image row
    LOUT = Cout * WP                   # lane width of the pooled feature rows

    assert H % 2 == 0 and W % 2 == 0
    assert 2 * LOUT <= 128 and w_cls.shape[1] == Cout * HP * WP

    NB = min(N, MAX_NB)                # images per grid step
    NBLK = -(-N // NB)                 # batch chunks
    N_pad = NBLK * NB
    R = HP * NB                        # matmul rows per step (h' outer, n inner)

    # ---- raw-input layout prep (one small fused XLA copy, ~10 KB/img) -------
    x_nhwc = jnp.transpose(x_nchw, (0, 2, 3, 1))
    x_pad = jnp.pad(x_nhwc, ((0, 0), (1, 1), (1, 1), (0, 0)))   # [N,H+2,W+2,Cin]
    rows = x_pad.reshape(N, H + 2, KIN)
    if N_pad != N:
        rows = jnp.pad(rows, ((0, N_pad - N), (0, 0), (0, 0)))
    # Four padded-row slabs per pooled output row h':
    #   slab s, row (h', n) = padded row 2*h' + s of image n.
    slabs = jnp.stack([rows[:, s:s + 2 * HP:2] for s in range(4)], axis=0)
    slabs = slabs.reshape(4, NBLK, NB, HP, KIN)
    slabs = jnp.transpose(slabs, (1, 0, 3, 2, 4))                # [NBLK,4,HP,NB,KIN]
    x_slabs = slabs.reshape(NBLK, 4, R, KIN)

    # ---- static weight folding (weight path only) ---------------------------
    we = _banded_conv_weight(w_conv, W, parity=0)        # even output columns
    wo = _banded_conv_weight(w_conv, W, parity=1)        # odd  output columns
    w_eo = jnp.concatenate([we, wo], axis=-1)            # [3, KIN, 2*LOUT] (128 lanes)
    bconv_row = jnp.repeat(b_conv, WP).reshape(1, LOUT)  # bias per (o, w') lane
    wcls_k = _remap_classifier(w_cls, Cout, HP, WP)      # [HP, LOUT, NWAY_PAD]
    bcls_row = jnp.pad(b_cls, (0, NWAY_PAD - n_way)).reshape(1, NWAY_PAD)

    def kernel(x_ref, w_ref, bc_ref, wk_ref, bk_ref, o_ref):
        f32 = jnp.float32
        e0 = x_ref[0, 0]     # [R, KIN]  padded rows 2h'
        o0 = x_ref[0, 1]     #           padded rows 2h'+1
        e1 = x_ref[0, 2]     #           padded rows 2h'+2
        o1 = x_ref[0, 3]     #           padded rows 2h'+3

        def conv3(r0, r1, r2):
            acc = jnp.dot(r0, w_ref[0], preferred_element_type=f32)
            acc = acc + jnp.dot(r1, w_ref[1], preferred_element_type=f32)
            acc = acc + jnp.dot(r2, w_ref[2], preferred_element_type=f32)
            return acc                                   # [R, 2*LOUT] even|odd cols

        pe = conv3(e0, o0, e1)                           # conv at rows 2h'
        po = conv3(o0, e1, o1)                           # conv at rows 2h'+1
        p = jnp.maximum(pe, po)                          # max over row phase
        # max over col phase (lane split), then bias + ReLU (commute with max)
        pooled = jnp.maximum(
            jnp.maximum(p[:, :LOUT], p[:, LOUT:]) + bc_ref[...], 0.0)   # [R, LOUT]

        # Classifier: contiguous [NB, LOUT] slabs per h' (rows = h'*NB + n);
        # weights already remapped to PyTorch NCHW-flatten order.
        acc = jnp.dot(pooled[0:NB, :], wk_ref[0], preferred_element_type=f32)
        for hp in range(1, HP):
            acc = acc + jnp.dot(pooled[hp * NB:(hp + 1) * NB, :], wk_ref[hp],
                                preferred_element_type=f32)
        o_ref[...] = (acc + bk_ref[...]).astype(o_ref.dtype)

    scores_pad = pl.pallas_call(
        kernel,
        out_shape=jax.ShapeDtypeStruct((N_pad, NWAY_PAD), jnp.float32),
        grid=(NBLK,),
        in_specs=[
            pl.BlockSpec((1, 4, R, KIN), lambda b: (b, 0, 0, 0)),        # row slabs
            pl.BlockSpec((3, KIN, 2 * LOUT), lambda b: (0, 0, 0)),       # conv W (even|odd)
            pl.BlockSpec((1, LOUT), lambda b: (0, 0)),                   # conv bias
            pl.BlockSpec((HP, LOUT, NWAY_PAD), lambda b: (0, 0, 0)),     # cls W
            pl.BlockSpec((1, NWAY_PAD), lambda b: (0, 0)),               # cls bias
        ],
        out_specs=pl.BlockSpec((NB, NWAY_PAD), lambda b: (b, 0)),
        compiler_params=pltpu.CompilerParams(
            dimension_semantics=("parallel",)),
    )(x_slabs, w_eo, bconv_row, wcls_k, bcls_row)

    return scores_pad[:N, :n_way]                                        # [N, n_way]


# ----------------------------- pure-JAX reference ----------------------------

def maml_forward_ref(x_nchw, params):
    w_conv, b_conv = params["w_conv"], params["b_conv"]
    w_cls, b_cls = params["w_cls"], params["b_cls"]
    N = x_nchw.shape[0]
    y = lax.conv_general_dilated(
        x_nchw, w_conv, window_strides=(1, 1), padding="SAME",
        dimension_numbers=("NCHW", "OIHW", "NCHW"))
    y = y + b_conv[None, :, None, None]
    y = jnp.maximum(y, 0.0)
    Nc, C, H, W = y.shape
    y = jnp.max(y.reshape(Nc, C, H // 2, 2, W // 2, 2), axis=(3, 5))
    feat = y.reshape(N, -1)
    return feat @ w_cls.T + b_cls[None, :]


# ----------------------------------- main ------------------------------------

if __name__ == "__main__":
    # Small shapes consistent with the module (x_dim-like input, n_way classes).
    N, Cin, H, W = 2, 4, 16, 16
    Cout = 8
    n_way = 5
    feat_dim = Cout * (H // 2) * (W // 2)   # encoder(x).view(N, -1).shape[-1]

    key = jax.random.PRNGKey(0)
    k_x, k_wc, k_bc, k_wl = jax.random.split(key, 4)

    x = jax.random.normal(k_x, (N, Cin, H, W), dtype=jnp.float32)

    params = {
        "w_conv": 0.1 * jax.random.normal(k_wc, (Cout, Cin, 3, 3), jnp.float32),
        "b_conv": 0.1 * jax.random.normal(k_bc, (Cout,), jnp.float32),
        "w_cls":  0.05 * jax.random.normal(k_wl, (n_way, feat_dim), jnp.float32),
        "b_cls":  jnp.zeros((n_way,), jnp.float32),   # classifier.bias.data.fill_(0)
    }

    scores = jax.jit(maml_forward)(x, params)
    scores = jax.block_until_ready(scores)

    ref = maml_forward_ref(x, params)
    assert scores.shape == (N, n_way)
    assert jnp.allclose(scores, ref, rtol=1e-5, atol=1e-4), (
        f"mismatch: max abs err {jnp.max(jnp.abs(scores - ref))}")

    print("KERNEL_OK")
</pallas_src>

<mosaic_0001>
module attributes {stable_mosaic.version = 11 : i64} {
  func.func @kernel(%arg0: i32, %arg1: memref<1x4x16x72xf32, #tpu.memory_space<vmem>>, %arg2: memref<3x72x128xf32, #tpu.memory_space<vmem>>, %arg3: memref<1x64xf32, #tpu.memory_space<vmem>>, %arg4: memref<8x64x128xf32, #tpu.memory_space<vmem>>, %arg5: memref<1x128xf32, #tpu.memory_space<vmem>>, %arg6: memref<2x128xf32, #tpu.memory_space<vmem>>) attributes {dimension_semantics = [#tpu.dimension_semantics<parallel>], iteration_bounds = array<i64: 1>, scalar_prefetch = 0 : i64, scratch_operands = 0 : i64, tpu.core_type = #tpu.core_type<tc>, window_params = [{transform_indices = @transform_0, window_bounds = array<i64: 1, 4, 16, 72>}, {pipeline_mode = #tpu.pipeline_mode<synchronous>, transform_indices = @transform_1, window_bounds = array<i64: 3, 72, 128>}, {pipeline_mode = #tpu.pipeline_mode<synchronous>, transform_indices = @transform_2, window_bounds = array<i64: 1, 64>}, {pipeline_mode = #tpu.pipeline_mode<synchronous>, transform_indices = @transform_3, window_bounds = array<i64: 8, 64, 128>}, {pipeline_mode = #tpu.pipeline_mode<synchronous>, transform_indices = @transform_4, window_bounds = array<i64: 1, 128>}, {transform_indices = @transform_5, window_bounds = array<i64: 2, 128>}]} {
    %c0 = arith.constant 0 : index
    %c0_0 = arith.constant 0 : index
    %c0_1 = arith.constant 0 : index
    %c0_2 = arith.constant 0 : index
    %0 = vector.load %arg1[%c0, %c0_0, %c0_1, %c0_2] : memref<1x4x16x72xf32, #tpu.memory_space<vmem>>, vector<1x1x16x72xf32>
    %1 = vector.shape_cast %0 : vector<1x1x16x72xf32> to vector<16x72xf32>
    %c0_3 = arith.constant 0 : index
    %c1 = arith.constant 1 : index
    %c0_4 = arith.constant 0 : index
    %c0_5 = arith.constant 0 : index
    %2 = vector.load %arg1[%c0_3, %c1, %c0_4, %c0_5] : memref<1x4x16x72xf32, #tpu.memory_space<vmem>>, vector<1x1x16x72xf32>
    %3 = vector.shape_cast %2 : vector<1x1x16x72xf32> to vector<16x72xf32>
    %c0_6 = arith.constant 0 : index
    %c2 = arith.constant 2 : index
    %c0_7 = arith.constant 0 : index
    %c0_8 = arith.constant 0 : index
    %4 = vector.load %arg1[%c0_6, %c2, %c0_7, %c0_8] : memref<1x4x16x72xf32, #tpu.memory_space<vmem>>, vector<1x1x16x72xf32>
    %5 = vector.shape_cast %4 : vector<1x1x16x72xf32> to vector<16x72xf32>
    %c0_9 = arith.constant 0 : index
    %c3 = arith.constant 3 : index
    %c0_10 = arith.constant 0 : index
    %c0_11 = arith.constant 0 : index
    %6 = vector.load %arg1[%c0_9, %c3, %c0_10, %c0_11] : memref<1x4x16x72xf32, #tpu.memory_space<vmem>>, vector<1x1x16x72xf32>
    %7 = vector.shape_cast %6 : vector<1x1x16x72xf32> to vector<16x72xf32>
    %c0_12 = arith.constant 0 : index
    %c0_13 = arith.constant 0 : index
    %c0_14 = arith.constant 0 : index
    %8 = vector.load %arg2[%c0_12, %c0_13, %c0_14] : memref<3x72x128xf32, #tpu.memory_space<vmem>>, vector<1x72x128xf32>
    %9 = vector.shape_cast %8 : vector<1x72x128xf32> to vector<72x128xf32>
    %cst = arith.constant dense<0.000000e+00> : vector<16x128xf32>
    %10 = tpu.matmul %1, %9, %cst {dimension_numbers = #tpu.dot_dimension_numbers<[1], [0], [0], [1], [0, 0, 1, 1], [], []>} : vector<16x72xf32>, vector<72x128xf32>, vector<16x128xf32> -> vector<16x128xf32>
    %c1_15 = arith.constant 1 : index
    %c0_16 = arith.constant 0 : index
    %c0_17 = arith.constant 0 : index
    %11 = vector.load %arg2[%c1_15, %c0_16, %c0_17] : memref<3x72x128xf32, #tpu.memory_space<vmem>>, vector<1x72x128xf32>
    %12 = vector.shape_cast %11 : vector<1x72x128xf32> to vector<72x128xf32>
    %cst_18 = arith.constant dense<0.000000e+00> : vector<16x128xf32>
    %13 = tpu.matmul %3, %12, %cst_18 {dimension_numbers = #tpu.dot_dimension_numbers<[1], [0], [0], [1], [0, 0, 1, 1], [], []>} : vector<16x72xf32>, vector<72x128xf32>, vector<16x128xf32> -> vector<16x128xf32>
    %14 = arith.addf %10, %13 : vector<16x128xf32>
    %c2_19 = arith.constant 2 : index
    %c0_20 = arith.constant 0 : index
    %c0_21 = arith.constant 0 : index
    %15 = vector.load %arg2[%c2_19, %c0_20, %c0_21] : memref<3x72x128xf32, #tpu.memory_space<vmem>>, vector<1x72x128xf32>
    %16 = vector.shape_cast %15 : vector<1x72x128xf32> to vector<72x128xf32>
    %cst_22 = arith.constant dense<0.000000e+00> : vector<16x128xf32>
    %17 = tpu.matmul %5, %16, %cst_22 {dimension_numbers = #tpu.dot_dimension_numbers<[1], [0], [0], [1], [0, 0, 1, 1], [], []>} : vector<16x72xf32>, vector<72x128xf32>, vector<16x128xf32> -> vector<16x128xf32>
    %18 = arith.addf %14, %17 : vector<16x128xf32>
    %c0_23 = arith.constant 0 : index
    %c0_24 = arith.constant 0 : index
    %c0_25 = arith.constant 0 : index
    %19 = vector.load %arg2[%c0_23, %c0_24, %c0_25] : memref<3x72x128xf32, #tpu.memory_space<vmem>>, vector<1x72x128xf32>
    %20 = vector.shape_cast %19 : vector<1x72x128xf32> to vector<72x128xf32>
    %cst_26 = arith.constant dense<0.000000e+00> : vector<16x128xf32>
    %21 = tpu.matmul %3, %20, %cst_26 {dimension_numbers = #tpu.dot_dimension_numbers<[1], [0], [0], [1], [0, 0, 1, 1], [], []>} : vector<16x72xf32>, vector<72x128xf32>, vector<16x128xf32> -> vector<16x128xf32>
    %c1_27 = arith.constant 1 : index
    %c0_28 = arith.constant 0 : index
    %c0_29 = arith.constant 0 : index
    %22 = vector.load %arg2[%c1_27, %c0_28, %c0_29] : memref<3x72x128xf32, #tpu.memory_space<vmem>>, vector<1x72x128xf32>
    %23 = vector.shape_cast %22 : vector<1x72x128xf32> to vector<72x128xf32>
    %cst_30 = arith.constant dense<0.000000e+00> : vector<16x128xf32>
    %24 = tpu.matmul %5, %23, %cst_30 {dimension_numbers = #tpu.dot_dimension_numbers<[1], [0], [0], [1], [0, 0, 1, 1], [], []>} : vector<16x72xf32>, vector<72x128xf32>, vector<16x128xf32> -> vector<16x128xf32>
    %25 = arith.addf %21, %24 : vector<16x128xf32>
    %c2_31 = arith.constant 2 : index
    %c0_32 = arith.constant 0 : index
    %c0_33 = arith.constant 0 : index
    %26 = vector.load %arg2[%c2_31, %c0_32, %c0_33] : memref<3x72x128xf32, #tpu.memory_space<vmem>>, vector<1x72x128xf32>
    %27 = vector.shape_cast %26 : vector<1x72x128xf32> to vector<72x128xf32>
    %cst_34 = arith.constant dense<0.000000e+00> : vector<16x128xf32>
    %28 = tpu.matmul %7, %27, %cst_34 {dimension_numbers = #tpu.dot_dimension_numbers<[1], [0], [0], [1], [0, 0, 1, 1], [], []>} : vector<16x72xf32>, vector<72x128xf32>, vector<16x128xf32> -> vector<16x128xf32>
    %29 = arith.addf %25, %28 : vector<16x128xf32>
    %30 = arith.maximumf %18, %29 : vector<16x128xf32>
    %31 = vector.extract_strided_slice %30 {offsets = [0, 0], sizes = [16, 64], strides = [1, 1]} : vector<16x128xf32> to vector<16x64xf32>
    %32 = vector.extract_strided_slice %30 {offsets = [0, 64], sizes = [16, 64], strides = [1, 1]} : vector<16x128xf32> to vector<16x64xf32>
    %33 = arith.maximumf %31, %32 : vector<16x64xf32>
    %c0_35 = arith.constant 0 : index
    %c0_36 = arith.constant 0 : index
    %34 = vector.load %arg3[%c0_35, %c0_36] : memref<1x64xf32, #tpu.memory_space<vmem>>, vector<1x64xf32>
    %35 = vector.broadcast %34 : vector<1x64xf32> to vector<16x64xf32>
    %36 = arith.addf %33, %35 : vector<16x64xf32>
    %cst_37 = arith.constant 0.000000e+00 : f32
    %37 = vector.broadcast %cst_37 : f32 to vector<16x64xf32>
    %38 = arith.maximumf %36, %37 : vector<16x64xf32>
    %39 = vector.extract_strided_slice %38 {offsets = [0, 0], sizes = [2, 64], strides = [1, 1]} : vector<16x64xf32> to vector<2x64xf32>
    %c0_38 = arith.constant 0 : index
    %c0_39 = arith.constant 0 : index
    %c0_40 = arith.constant 0 : index
    %40 = vector.load %arg4[%c0_38, %c0_39, %c0_40] : memref<8x64x128xf32, #tpu.memory_space<vmem>>, vector<1x64x128xf32>
    %41 = vector.shape_cast %40 : vector<1x64x128xf32> to vector<64x128xf32>
    %cst_41 = arith.constant dense<0.000000e+00> : vector<2x128xf32>
    %42 = tpu.matmul %39, %41, %cst_41 {dimension_numbers = #tpu.dot_dimension_numbers<[1], [0], [0], [1], [0, 0, 1, 1], [], []>} : vector<2x64xf32>, vector<64x128xf32>, vector<2x128xf32> -> vector<2x128xf32>
    %43 = vector.extract_strided_slice %38 {offsets = [2, 0], sizes = [2, 64], strides = [1, 1]} : vector<16x64xf32> to vector<2x64xf32>
    %c1_42 = arith.constant 1 : index
    %c0_43 = arith.constant 0 : index
    %c0_44 = arith.constant 0 : index
    %44 = vector.load %arg4[%c1_42, %c0_43, %c0_44] : memref<8x64x128xf32, #tpu.memory_space<vmem>>, vector<1x64x128xf32>
    %45 = vector.shape_cast %44 : vector<1x64x128xf32> to vector<64x128xf32>
    %cst_45 = arith.constant dense<0.000000e+00> : vector<2x128xf32>
    %46 = tpu.matmul %43, %45, %cst_45 {dimension_numbers = #tpu.dot_dimension_numbers<[1], [0], [0], [1], [0, 0, 1, 1], [], []>} : vector<2x64xf32>, vector<64x128xf32>, vector<2x128xf32> -> vector<2x128xf32>
    %47 = arith.addf %42, %46 : vector<2x128xf32>
    %48 = vector.extract_strided_slice %38 {offsets = [4, 0], sizes = [2, 64], strides = [1, 1]} : vector<16x64xf32> to vector<2x64xf32>
    %c2_46 = arith.constant 2 : index
    %c0_47 = arith.constant 0 : index
    %c0_48 = arith.constant 0 : index
    %49 = vector.load %arg4[%c2_46, %c0_47, %c0_48] : memref<8x64x128xf32, #tpu.memory_space<vmem>>, vector<1x64x128xf32>
    %50 = vector.shape_cast %49 : vector<1x64x128xf32> to vector<64x128xf32>
    %cst_49 = arith.constant dense<0.000000e+00> : vector<2x128xf32>
    %51 = tpu.matmul %48, %50, %cst_49 {dimension_numbers = #tpu.dot_dimension_numbers<[1], [0], [0], [1], [0, 0, 1, 1], [], []>} : vector<2x64xf32>, vector<64x128xf32>, vector<2x128xf32> -> vector<2x128xf32>
    %52 = arith.addf %47, %51 : vector<2x128xf32>
    %53 = vector.extract_strided_slice %38 {offsets = [6, 0], sizes = [2, 64], strides = [1, 1]} : vector<16x64xf32> to vector<2x64xf32>
    %c3_50 = arith.constant 3 : index
    %c0_51 = arith.constant 0 : index
    %c0_52 = arith.constant 0 : index
    %54 = vector.load %arg4[%c3_50, %c0_51, %c0_52] : memref<8x64x128xf32, #tpu.memory_space<vmem>>, vector<1x64x128xf32>
    %55 = vector.shape_cast %54 : vector<1x64x128xf32> to vector<64x128xf32>
    %cst_53 = arith.constant dense<0.000000e+00> : vector<2x128xf32>
    %56 = tpu.matmul %53, %55, %cst_53 {dimension_numbers = #tpu.dot_dimension_numbers<[1], [0], [0], [1], [0, 0, 1, 1], [], []>} : vector<2x64xf32>, vector<64x128xf32>, vector<2x128xf32> -> vector<2x128xf32>
    %57 = arith.addf %52, %56 : vector<2x128xf32>
    %58 = vector.extract_strided_slice %38 {offsets = [8, 0], sizes = [2, 64], strides = [1, 1]} : vector<16x64xf32> to vector<2x64xf32>
    %c4 = arith.constant 4 : index
    %c0_54 = arith.constant 0 : index
    %c0_55 = arith.constant 0 : index
    %59 = vector.load %arg4[%c4, %c0_54, %c0_55] : memref<8x64x128xf32, #tpu.memory_space<vmem>>, vector<1x64x128xf32>
    %60 = vector.shape_cast %59 : vector<1x64x128xf32> to vector<64x128xf32>
    %cst_56 = arith.constant dense<0.000000e+00> : vector<2x128xf32>
    %61 = tpu.matmul %58, %60, %cst_56 {dimension_numbers = #tpu.dot_dimension_numbers<[1], [0], [0], [1], [0, 0, 1, 1], [], []>} : vector<2x64xf32>, vector<64x128xf32>, vector<2x128xf32> -> vector<2x128xf32>
    %62 = arith.addf %57, %61 : vector<2x128xf32>
    %63 = vector.extract_strided_slice %38 {offsets = [10, 0], sizes = [2, 64], strides = [1, 1]} : vector<16x64xf32> to vector<2x64xf32>
    %c5 = arith.constant 5 : index
    %c0_57 = arith.constant 0 : index
    %c0_58 = arith.constant 0 : index
    %64 = vector.load %arg4[%c5, %c0_57, %c0_58] : memref<8x64x128xf32, #tpu.memory_space<vmem>>, vector<1x64x128xf32>
    %65 = vector.shape_cast %64 : vector<1x64x128xf32> to vector<64x128xf32>
    %cst_59 = arith.constant dense<0.000000e+00> : vector<2x128xf32>
    %66 = tpu.matmul %63, %65, %cst_59 {dimension_numbers = #tpu.dot_dimension_numbers<[1], [0], [0], [1], [0, 0, 1, 1], [], []>} : vector<2x64xf32>, vector<64x128xf32>, vector<2x128xf32> -> vector<2x128xf32>
    %67 = arith.addf %62, %66 : vector<2x128xf32>
    %68 = vector.extract_strided_slice %38 {offsets = [12, 0], sizes = [2, 64], strides = [1, 1]} : vector<16x64xf32> to vector<2x64xf32>
    %c6 = arith.constant 6 : index
    %c0_60 = arith.constant 0 : index
    %c0_61 = arith.constant 0 : index
    %69 = vector.load %arg4[%c6, %c0_60, %c0_61] : memref<8x64x128xf32, #tpu.memory_space<vmem>>, vector<1x64x128xf32>
    %70 = vector.shape_cast %69 : vector<1x64x128xf32> to vector<64x128xf32>
    %cst_62 = arith.constant dense<0.000000e+00> : vector<2x128xf32>
    %71 = tpu.matmul %68, %70, %cst_62 {dimension_numbers = #tpu.dot_dimension_numbers<[1], [0], [0], [1], [0, 0, 1, 1], [], []>} : vector<2x64xf32>, vector<64x128xf32>, vector<2x128xf32> -> vector<2x128xf32>
    %72 = arith.addf %67, %71 : vector<2x128xf32>
    %73 = vector.extract_strided_slice %38 {offsets = [14, 0], sizes = [2, 64], strides = [1, 1]} : vector<16x64xf32> to vector<2x64xf32>
    %c7 = arith.constant 7 : index
    %c0_63 = arith.constant 0 : index
    %c0_64 = arith.constant 0 : index
    %74 = vector.load %arg4[%c7, %c0_63, %c0_64] : memref<8x64x128xf32, #tpu.memory_space<vmem>>, vector<1x64x128xf32>
    %75 = vector.shape_cast %74 : vector<1x64x128xf32> to vector<64x128xf32>
    %cst_65 = arith.constant dense<0.000000e+00> : vector<2x128xf32>
    %76 = tpu.matmul %73, %75, %cst_65 {dimension_numbers = #tpu.dot_dimension_numbers<[1], [0], [0], [1], [0, 0, 1, 1], [], []>} : vector<2x64xf32>, vector<64x128xf32>, vector<2x128xf32> -> vector<2x128xf32>
    %77 = arith.addf %72, %76 : vector<2x128xf32>
    %c0_66 = arith.constant 0 : index
    %c0_67 = arith.constant 0 : index
    %78 = vector.load %arg5[%c0_66, %c0_67] : memref<1x128xf32, #tpu.memory_space<vmem>>, vector<1x128xf32>
    %79 = vector.broadcast %78 : vector<1x128xf32> to vector<2x128xf32>
    %80 = arith.addf %77, %79 : vector<2x128xf32>
    %c0_68 = arith.constant 0 : index
    %c0_69 = arith.constant 0 : index
    %81 = vector.load %arg6[%c0_68, %c0_69] : memref<2x128xf32, #tpu.memory_space<vmem>>, vector<2x128xf32>
    tpu.vector_store %arg6[%c0_68, %c0_69], %80 {strides = array<i32>} : memref<2x128xf32, #tpu.memory_space<vmem>>, vector<2x128xf32>,
    return
  }
  func.func @transform_0(%arg0: i32) -> (i32, i32, i32, i32) {
    %c0_i32 = arith.constant 0 : i32
    %c0_i32_0 = arith.constant 0 : i32
    %c0_i32_1 = arith.constant 0 : i32
    %c0_i32_2 = arith.constant 0 : i32
    return %arg0, %c0_i32, %c0_i32_0, %c0_i32_1 : i32, i32, i32, i32
  }
  func.func @transform_1(%arg0: i32) -> (i32, i32, i32) {
    %c0_i32 = arith.constant 0 : i32
    %c0_i32_0 = arith.constant 0 : i32
    %c0_i32_1 = arith.constant 0 : i32
    %c0_i32_2 = arith.constant 0 : i32
    return %c0_i32, %c0_i32_0, %c0_i32_1 : i32, i32, i32
  }
  func.func @transform_2(%arg0: i32) -> (i32, i32) {
    %c0_i32 = arith.constant 0 : i32
    %c0_i32_0 = arith.constant 0 : i32
    %c0_i32_1 = arith.constant 0 : i32
    return %c0_i32, %c0_i32_0 : i32, i32
  }
  func.func @transform_3(%arg0: i32) -> (i32, i32, i32) {
    %c0_i32 = arith.constant 0 : i32
    %c0_i32_0 = arith.constant 0 : i32
    %c0_i32_1 = arith.constant 0 : i32
    %c0_i32_2 = arith.constant 0 : i32
    return %c0_i32, %c0_i32_0, %c0_i32_1 : i32, i32, i32
  }
  func.func @transform_4(%arg0: i32) -> (i32, i32) {
    %c0_i32 = arith.constant 0 : i32
    %c0_i32_0 = arith.constant 0 : i32
    %c0_i32_1 = arith.constant 0 : i32
    return %c0_i32, %c0_i32_0 : i32, i32
  }
  func.func @transform_5(%arg0: i32) -> (i32, i32) {
    %c0_i32 = arith.constant 0 : i32
    %c0_i32_0 = arith.constant 0 : i32
    return %arg0, %c0_i32 : i32, i32
  }
}

</mosaic_0001>

<bundles_post_ra>
// kernel: maml_forward.1
= control target key start
LH: loop header
LB: loop body
LE: loop exit
PB: predicated region body
PF: predicated region fallthrough
CT: control target
= control target key end

     0   :  { %s2362_s0 = inlined_call_operand.vmem [shape: f32[1,4,16,72], index: 0, kind: input, shape index: {}]   ;;  %s2363_s1 = inlined_call_operand.vmem [shape: f32[3,72,128], index: 1, kind: input, shape index: {}]   ;;  %s2364_s2 = inlined_call_operand.vmem [shape: f32[1,64], index: 2, kind: input, shape index: {}]   ;;  %s2365_s3 = inlined_call_operand.vmem [shape: f32[8,64,128], index: 3, kind: input, shape index: {}]   ;;  %s2366_s4 = inlined_call_operand.vmem [shape: f32[1,128], index: 4, kind: input, shape index: {}]   ;;  %s2367_s5 = inlined_call_operand.hbm [shape: f32[2,128], index: 5, kind: output, shape index: {}]  }
   0x1   :  { %v1829_v0 = vld [vmem:[%s2363_s1 + $0x88] sm:$0xff]  ;;  %v1834_v1 = vld [vmem:[%s2363_s1 + $0x40] sm:$0xff]  ;;  %v1846_v3 = vld [vmem:[%s2363_s1 + $0x38] sm:$0xff] }
   0x2   :  { %v1839_v2 = vld [vmem:[%s2363_s1 + $0x80] sm:$0xff]  ;;  %1488 = vmatprep.subr.mxu0 %v1829_v0  ;;  %1509 = vmatprep.subr.mxu1 %v1834_v1  ;;  %v1853_v4 = vld [vmem:[%s2363_s1 + $0x78] sm:$0xff]  ;;  %v1858_v5 = vld [vmem:[%s2363_s1 + $0x30] sm:$0xff] }
   0x3   :  { %1489 = vmatpush3.msra.mxu0 %v1829_v0  ;;  %1510 = vmatpush3.msra.mxu1 %v1834_v1  ;;  %v1867_v6 = vld [vmem:[%s2363_s1 + $0x70] sm:$0xff]  ;;  %v1872_v7 = vld [vmem:[%s2363_s1 + $0x28] sm:$0xff]  ;;  %v1886_v9 = vld [vmem:[%s2363_s1 + $0x20] sm:$0xff] }
   0x4   :  { %1490 = vmatprep.subr.mxu0 %v1839_v2  ;;  %1511 = vmatprep.subr.mxu1 %v1846_v3  ;;  %v1881_v8 = vld [vmem:[%s2363_s1 + $0x68] sm:$0xff]  ;;  %v1895_v10 = vld [vmem:[%s2363_s1 + $0x60] sm:$0xff]  ;;  %v1900_v11 = vld [vmem:[%s2363_s1 + $0x18] sm:$0xff] }
   0x5   :  { %1491 = vmatpush3.msra.mxu0 %v1839_v2  ;;  %1512 = vmatpush3.msra.mxu1 %v1846_v3  ;;  %v1909_v12 = vld [vmem:[%s2363_s1 + $0x58] sm:$0xff]  ;;  %v1914_v13 = vld [vmem:[%s2363_s1 + $0x10] sm:$0xff] }
   0x6   :  { %1492 = vmatprep.subr.mxu0 %v1853_v4  ;;  %1513 = vmatprep.subr.mxu1 %v1858_v5 }
   0x7   :  { %1493 = vmatpush3.msra.mxu0 %v1853_v4  ;;  %1514 = vmatpush3.msra.mxu1 %v1858_v5 }
   0x8   :  { %1494 = vmatprep.subr.mxu0 %v1867_v6  ;;  %1515 = vmatprep.subr.mxu1 %v1872_v7 }
   0x9   :  { %1495 = vmatpush3.msra.mxu0 %v1867_v6  ;;  %1516 = vmatpush3.msra.mxu1 %v1872_v7 }
   0xa   :  { %1496 = vmatprep.subr.mxu0 %v1881_v8  ;;  %1517 = vmatprep.subr.mxu1 %v1886_v9 }
   0xb   :  { %1497 = vmatpush3.msra.mxu0 %v1881_v8  ;;  %1518 = vmatpush3.msra.mxu1 %v1886_v9 }
   0xc   :  { %1498 = vmatprep.subr.mxu0 %v1895_v10  ;;  %1519 = vmatprep.subr.mxu1 %v1900_v11 }
   0xd   :  { %10 = vsyncpa [#allocation3], 0  ;;  %1499 = vmatpush3.msra.mxu0 %v1895_v10  ;;  %1520 = vmatpush3.msra.mxu1 %v1900_v11  ;;  %v1923_v14 = vld [vmem:[%s2363_s1 + $0x50] sm:$0xff]  ;;  %v1928_v15 = vld [vmem:[%s2363_s1 + $0x8] sm:$0xff]  ;;  %vm51_vm0 = vcmask 588800   ;;  %v1792_v37 = vmov 0.0  }
   0xe   :  { %1500 = vmatprep.subr.mxu0 %v1909_v12  ;;  %1521 = vmatprep.subr.mxu1 %v1914_v13  ;;  %v1937_v16 = vld [vmem:[%s2363_s1 + $0x48] sm:$0xff]  ;;  %v1942_v17 = vld [vmem:[%s2363_s1] sm:$0xff]  ;;  %v1949_v18 = vld [vmem:[%s2362_s0 + $0x10] sm:$0xff]  ;;  %vm1793_vm1 = vmmov 0   ;;  %s1794_s16 = smov 64   ;;  %vm582_vm2 = vcmask 523264  }
   0xf   :  { %1501 = vmatpush3.msra.mxu0 %v1909_v12  ;;  %1522 = vmatpush3.msra.mxu1 %v1914_v13  ;;  %v21_v19 = vld [vmem:[%s2362_s0] sm:$0xff]  ;;  %v1961_v20 = vld [vmem:[%s2362_s0 + $0x18] sm:$0xff]  ;;  %v22_v21 = vld [vmem:[%s2362_s0 + $0x8] sm:$0xff]  ;;  %s1795_s6 = smov [#allocation2]  }
  0x10   :  { %1502 = vmatprep.subr.mxu0 %v1923_v14  ;;  %1523 = vmatprep.subr.mxu1 %v1928_v15  ;;  %v1275_v22 = vld [vmem:[%s2363_s1 + $0xd0] sm:$0xff]  ;;  %v1274_v23 = vld [vmem:[%s2363_s1 + $0xc8] sm:$0xff]  ;;  %v1273_v24 = vld [vmem:[%s2363_s1 + $0xc0] sm:$0xff]  ;;  %s1240_s7 = sshll.u32 %s1795_s6, 4  ;;  %s1241_s7 = int_to_ptr.vmem [resolvable:$true] %s1240_s7 }
  0x11   :  { %1503 = vmatpush3.msra.mxu0 %v1923_v14  ;;  %1524 = vmatpush3.msra.mxu1 %v1928_v15  ;;  %v1272_v25 = vld [vmem:[%s2363_s1 + $0xb8] sm:$0xff]  ;;  %v1271_v26 = vld [vmem:[%s2363_s1 + $0xb0] sm:$0xff]  ;;  %v1270_v27 = vld [vmem:[%s2363_s1 + $0xa8] sm:$0xff]  ;;  %s1770_s8 = scalar_lea.vmem %s1241_s7, 32  ;;  %p1775_p1 = scmp.lt.s32.totalorder %s1241_s7, %s1241_s7 }
  0x12   :  { %1504 = vmatprep.subr.mxu0 %v1937_v16  ;;  %1525 = vmatprep.subr.mxu1 %v1942_v17  ;;  %v1269_v28 = vld [vmem:[%s2363_s1 + $0xa0] sm:$0xff]  ;;  %v1268_v29 = vld [vmem:[%s2363_s1 + $0x98] sm:$0xff]  ;;  %v1267_v30 = vld [vmem:[%s2363_s1 + $0x90] sm:$0xff]  ;;  %p1771_p0 = scmp.ne.s32.totalorder %s1241_s7, %s1770_s8  ;;  %p1776_p2 = scmp.lt.s32.totalorder %s1770_s8, %s1770_s8 }
  0x13   :  { %1505 = vmatpush3.msra.mxu0 %v1937_v16  ;;  %1506 = vmatprep.mubr.msk.f32.mxu0 %vm51_vm0, %v1949_v18  ;;  %v1250_v31 = vld [vmem:[%s2362_s0 + $0x20] sm:$0xff]  ;;  %v1251_v32 = vld [vmem:[%s2362_s0 + $0x28] sm:$0xff]  ;;  %v1252_v33 = vld [vmem:[%s2362_s0 + $0x30] sm:$0xff] }
  0x14   :  { %1526 = vmatpush3.msra.mxu1 %v1942_v17  ;;  %1527 = vmatprep.mubr.msk.f32.mxu1 %vm51_vm0, %v21_v19  ;;  %v1253_v34 = vld [vmem:[%s2362_s0 + $0x38] sm:$0xff]  ;;  %v569_v38 = vld [vmem:[%s2365_s3 + $0x30] sm:$0xff]  ;;  %v568_v40 = vld [vmem:[%s2365_s3 + $0x28] sm:$0xff]  ;;  %p1777_p3 = por %p1776_p2, %p1775_p1 }
  0x15   :  { %1507 = vmatmul.mubr.msk.f32.vlgmr.msra.gmra.mxu0 %vm51_vm0, %v1961_v20  ;;  %1528 = vmatmul.mubr.msk.f32.vlgmr.msra.gmra.mxu1 %vm51_vm0, %v22_v21  ;;  %v570_v35 = vld [vmem:[%s2365_s3 + $0x38] sm:$0xff]  ;;  %v1291_v39 = vld [vmem:[%s2365_s3 + $0x70] sm:$0xff]  ;;  %v1290_v41 = vld [vmem:[%s2365_s3 + $0x68] sm:$0xff] }
  0x16   :  { %1530 = vmatprep.subr.mxu0 %v1275_v22  ;;  %1551 = vmatprep.subr.mxu1 %v1829_v0  ;;  %v1292_v36 = vld [vmem:[%s2365_s3 + $0x78] sm:$0xff]  ;;  %v567_v42 = vld [vmem:[%s2365_s3 + $0x20] sm:$0xff]  ;;  %v565_v52 = vld [vmem:[%s2365_s3 + $0x10] sm:$0xff]  ;;  %p1778_p4 = pnand %p1777_p3, %p1771_p0 }
  0x17   :  { %1531 = vmatpush3.msra.mxu0 %v1275_v22  ;;  %1552 = vmatpush3.msra.mxu1 %v1829_v0  ;;  %v1289_v43 = vld [vmem:[%s2365_s3 + $0x60] sm:$0xff]  ;;  %v566_v44 = vld [vmem:[%s2365_s3 + $0x18] sm:$0xff]  ;;  %v1287_v53 = vld [vmem:[%s2365_s3 + $0x50] sm:$0xff] }
  0x18   :  { %1532 = vmatprep.subr.mxu0 %v1274_v23  ;;  %1553 = vmatprep.subr.mxu1 %v1839_v2  ;;  %v1288_v51 = vld [vmem:[%s2365_s3 + $0x58] sm:$0xff]  ;;  %v564_v54 = vld [vmem:[%s2365_s3 + $0x8] sm:$0xff]  ;;  %v563_v58 = vld [vmem:[%s2365_s3] sm:$0xff] }
  0x19   :  { %1533 = vmatpush3.msra.mxu0 %v1274_v23  ;;  %1554 = vmatpush3.msra.mxu1 %v1839_v2  ;;  %v1286_v57 = vld [vmem:[%s2365_s3 + $0x48] sm:$0xff]  ;;  %v1285_v61 = vld [vmem:[%s2365_s3 + $0x40] sm:$0xff]  ;;  %v1301_v19 = vld [vmem:[%s2365_s3 + $0xb0] sm:$0xff] }
  0x1a   :  { %1534 = vmatprep.subr.mxu0 %v1273_v24  ;;  %1555 = vmatprep.subr.mxu1 %v1853_v4  ;;  %v1300_v21 = vld [vmem:[%s2365_s3 + $0xa8] sm:$0xff] }
  0x1b   :  { %1535 = vmatpush3.msra.mxu0 %v1273_v24  ;;  %1556 = vmatpush3.msra.mxu1 %v1853_v4 }
  0x1c   :  { %1536 = vmatprep.subr.mxu0 %v1272_v25  ;;  %1557 = vmatprep.subr.mxu1 %v1867_v6 }
  0x1d   :  { %1537 = vmatpush3.msra.mxu0 %v1272_v25  ;;  %1558 = vmatpush3.msra.mxu1 %v1867_v6 }
  0x1e   :  { %1538 = vmatprep.subr.mxu0 %v1271_v26  ;;  %1559 = vmatprep.subr.mxu1 %v1881_v8 }
  0x1f   :  { %1539 = vmatpush3.msra.mxu0 %v1271_v26  ;;  %1560 = vmatpush3.msra.mxu1 %v1881_v8 }
  0x20   :  { %1540 = vmatprep.subr.mxu0 %v1270_v27  ;;  %1561 = vmatprep.subr.mxu1 %v1895_v10 }
  0x21   :  { %1541 = vmatpush3.msra.mxu0 %v1270_v27  ;;  %1562 = vmatpush3.msra.mxu1 %v1895_v10  ;;  %v2135_v10 = vld [vmem:[%s2364_s2] ss:$0 sm:$0xff] }
  0x22   :  { %1542 = vmatprep.subr.mxu0 %v1269_v28  ;;  %1563 = vmatprep.subr.mxu1 %v1909_v12 }
  0x23   :  { %1543 = vmatpush3.msra.mxu0 %v1269_v28  ;;  %1564 = vmatpush3.msra.mxu1 %v1909_v12 }
  0x24   :  { %1544 = vmatprep.subr.mxu0 %v1268_v29  ;;  %1565 = vmatprep.subr.mxu1 %v1923_v14 }
  0x25   :  { %1545 = vmatpush3.msra.mxu0 %v1268_v29  ;;  %1566 = vmatpush3.msra.mxu1 %v1923_v14 }
  0x26   :  { %1546 = vmatprep.subr.mxu0 %v1267_v30  ;;  %1567 = vmatprep.subr.mxu1 %v1937_v16 }
  0x27   :  { %1547 = vmatpush3.msra.mxu0 %v1267_v30  ;;  %1548 = vmatprep.mubr.msk.f32.mxu0 %vm51_vm0, %v1250_v31 }
  0x28   :  { %1568 = vmatpush3.msra.mxu1 %v1937_v16  ;;  %1549 = vmatmul.mubr.msk.f32.vlgmr.msra.gmra.mxu0 %vm51_vm0, %v1251_v32 }
  0x29   :  { %1569 = vmatprep.mubr.msk.f32.mxu1 %vm51_vm0, %v1250_v31  ;;  %1572 = vmatprep.subr.mxu0 %v1834_v1 }
  0x2a   :  { %1593 = vmatprep.subr.mxu1 %v1275_v22  ;;  %1570 = vmatmul.mubr.msk.f32.vlgmr.msra.gmra.mxu1 %vm51_vm0, %v1251_v32  ;;  %v1295_v32 = vld [vmem:[%s2365_s3 + $0x80] sm:$0xff] }
  0x2b   :  { %1573 = vmatpush3.msra.mxu0 %v1834_v1  ;;  %1594 = vmatpush3.msra.mxu1 %v1275_v22  ;;  %v1308_v22 = vld [vmem:[%s2365_s3 + $0xe0] sm:$0xff] }
  0x2c   :  { %1574 = vmatprep.subr.mxu0 %v1846_v3  ;;  %1595 = vmatprep.subr.mxu1 %v1274_v23 }
  0x2d   :  { %1575 = vmatpush3.msra.mxu0 %v1846_v3  ;;  %1596 = vmatpush3.msra.mxu1 %v1274_v23  ;;  %v1299_v23 = vld [vmem:[%s2365_s3 + $0xa0] sm:$0xff] }
  0x2e   :  { %1576 = vmatprep.subr.mxu0 %v1858_v5  ;;  %1597 = vmatprep.subr.mxu1 %v1273_v24 }
  0x2f   :  { %1577 = vmatpush3.msra.mxu0 %v1858_v5  ;;  %1598 = vmatpush3.msra.mxu1 %v1273_v24  ;;  %v1307_v24 = vld [vmem:[%s2365_s3 + $0xd8] sm:$0xff] }
  0x30   :  { %1578 = vmatprep.subr.mxu0 %v1872_v7  ;;  %1599 = vmatprep.subr.mxu1 %v1272_v25 }
  0x31   :  { %1579 = vmatpush3.msra.mxu0 %v1872_v7  ;;  %1600 = vmatpush3.msra.mxu1 %v1272_v25  ;;  %v1298_v25 = vld [vmem:[%s2365_s3 + $0x98] sm:$0xff] }
  0x32   :  { %1580 = vmatprep.subr.mxu0 %v1886_v9  ;;  %1601 = vmatprep.subr.mxu1 %v1271_v26 }
  0x33   :  { %1581 = vmatpush3.msra.mxu0 %v1886_v9  ;;  %1602 = vmatpush3.msra.mxu1 %v1271_v26  ;;  %v1306_v26 = vld [vmem:[%s2365_s3 + $0xd0] sm:$0xff] }
  0x34   :  { %1582 = vmatprep.subr.mxu0 %v1900_v11  ;;  %1603 = vmatprep.subr.mxu1 %v1270_v27 }
  0x35   :  { %1583 = vmatpush3.msra.mxu0 %v1900_v11  ;;  %1604 = vmatpush3.msra.mxu1 %v1270_v27  ;;  %v1297_v27 = vld [vmem:[%s2365_s3 + $0x90] sm:$0xff] }
  0x36   :  { %1584 = vmatprep.subr.mxu0 %v1914_v13  ;;  %1605 = vmatprep.subr.mxu1 %v1269_v28 }
  0x37   :  { %1585 = vmatpush3.msra.mxu0 %v1914_v13  ;;  %1606 = vmatpush3.msra.mxu1 %v1269_v28  ;;  %v1305_v28 = vld [vmem:[%s2365_s3 + $0xc8] sm:$0xff] }
  0x38   :  { %1586 = vmatprep.subr.mxu0 %v1928_v15  ;;  %1607 = vmatprep.subr.mxu1 %v1268_v29 }
  0x39   :  { %1587 = vmatpush3.msra.mxu0 %v1928_v15  ;;  %1608 = vmatpush3.msra.mxu1 %v1268_v29  ;;  %v1311_v15 = vld [vmem:[%s2365_s3 + $0xf8] sm:$0xff]  ;;  %v1296_v29 = vld [vmem:[%s2365_s3 + $0x88] sm:$0xff] }
  0x3a   :  { %1588 = vmatprep.subr.mxu0 %v1942_v17  ;;  %1609 = vmatprep.subr.mxu1 %v1267_v30 }
  0x3b   :  { %1589 = vmatpush3.msra.mxu0 %v1942_v17  ;;  %1590 = vmatprep.mubr.msk.f32.mxu0 %vm51_vm0, %v1949_v18  ;;  %v1302_v17 = vld [vmem:[%s2365_s3 + $0xb8] sm:$0xff]  ;;  %v1310_v18 = vld [vmem:[%s2365_s3 + $0xf0] sm:$0xff] }
  0x3c   :  { %1610 = vmatpush3.msra.mxu1 %v1267_v30  ;;  %1611 = vmatprep.mubr.msk.f32.mxu1 %vm51_vm0, %v1252_v33  ;;  %v1304_v30 = vld [vmem:[%s2365_s3 + $0xc0] sm:$0xff]  ;;  %v1329_v33 = vld [vmem:[%s2365_s3 + $0x178] sm:$0xff] }
  0x3d   :  { %1591 = vmatmul.mubr.msk.f32.vlgmr.msra.gmra.mxu0 %vm51_vm0, %v1961_v20  ;;  %1612 = vmatmul.mubr.msk.f32.vlgmr.msra.gmra.mxu1 %vm51_vm0, %v1253_v34  ;;  %v1309_v20 = vld [vmem:[%s2365_s3 + $0xe8] sm:$0xff] }
  0x3e   :  { %1633 = vmatprep.subr.mxu1 %v1792_v37  ;;  %1614 = vmatprep.subr.mxu0 %v1792_v37 }
  0x3f   :  { %1634 = vmatpush3.msra.mxu1 %v570_v35  ;;  %1615 = vmatpush3.msra.mxu0 %v1292_v36  ;;  %v1320_v36 = vld [vmem:[%s2365_s3 + $0x138] sm:$0xff] }
  0x40   :  { %1635 = vmatprep.subr.mxu1 %v1792_v37  ;;  %1616 = vmatprep.subr.mxu0 %v1792_v37 }
  0x41   :  { %1636 = vmatpush3.msra.mxu1 %v569_v38  ;;  %1617 = vmatpush3.msra.mxu0 %v1291_v39  ;;  %v1328_v38 = vld [vmem:[%s2365_s3 + $0x170] sm:$0xff] }
  0x42   :  { %1637 = vmatprep.subr.mxu1 %v1792_v37  ;;  %1618 = vmatprep.subr.mxu0 %v1792_v37  ;;  %v1319_v39 = vld [vmem:[%s2365_s3 + $0x130] sm:$0xff] }
  0x43   :  { %1638 = vmatpush3.msra.mxu1 %v568_v40  ;;  %1619 = vmatpush3.msra.mxu0 %v1290_v41  ;;  %v1327_v41 = vld [vmem:[%s2365_s3 + $0x168] sm:$0xff] }
  0x44   :  { %1639 = vmatprep.subr.mxu1 %v1792_v37  ;;  %1620 = vmatprep.subr.mxu0 %v1792_v37 }
  0x45   :  { %1640 = vmatpush3.msra.mxu1 %v567_v42  ;;  %1621 = vmatpush3.msra.mxu0 %v1289_v43  ;;  %v1318_v42 = vld [vmem:[%s2365_s3 + $0x128] sm:$0xff]  ;;  %v1326_v43 = vld [vmem:[%s2365_s3 + $0x160] sm:$0xff] }
  0x46   :  { %1641 = vmatprep.subr.mxu1 %v1792_v37  ;;  %1622 = vmatprep.subr.mxu0 %v1792_v37 }
  0x47   :  { %1642 = vmatpush3.msra.mxu1 %v566_v44  ;;  %1623 = vmatpush3.msra.mxu0 %v1288_v51  ;;  %v1317_v44 = vld [vmem:[%s2365_s3 + $0x120] sm:$0xff]  ;;  %v1323_v51 = vld [vmem:[%s2365_s3 + $0x148] sm:$0xff] }
  0x48   :  { %1643 = vmatprep.subr.mxu1 %v1792_v37  ;;  %1624 = vmatprep.subr.mxu0 %v1792_v37 }
  0x49   :  { %1644 = vmatpush3.msra.mxu1 %v565_v52  ;;  %1625 = vmatpush3.msra.mxu0 %v1287_v53  ;;  %v1314_v52 = vld [vmem:[%s2365_s3 + $0x108] sm:$0xff]  ;;  %v1322_v53 = vld [vmem:[%s2365_s3 + $0x140] sm:$0xff] }
  0x4a   :  { %1645 = vmatprep.subr.mxu1 %v1792_v37  ;;  %1626 = vmatprep.subr.mxu0 %v1792_v37 }
  0x4b   :  { %1646 = vmatpush3.msra.mxu1 %v564_v54  ;;  %1627 = vmatpush3.msra.mxu0 %v1286_v57  ;;  %v1338_v57 = vld [vmem:[%s2365_s3 + $0x1b8] sm:$0xff] }
  0x4c   :  { %1647 = vmatprep.subr.mxu1 %v1792_v37  ;;  %1628 = vmatprep.subr.mxu0 %v1792_v37 }
  0x4d   :  { %1648 = vmatpush3.msra.mxu1 %v563_v58  ;;  %1649 = vmatprep.mubr.msk.f32.mxu1 %vm1793_vm1, %v1792_v37  ;;  %v1346_v58 = vld [vmem:[%s2365_s3 + $0x1f0] sm:$0xff] }
  0x4e   :  { %1671 = vmatprep.subr.mxu1 %v1792_v37  ;;  %1629 = vmatpush3.msra.mxu0 %v1285_v61  ;;  %v1336_v61 = vld [vmem:[%s2365_s3 + $0x1a8] sm:$0xff] }
  0x4f   :  { %1630 = vmatprep.mubr.msk.f32.mxu0 %vm1793_vm1, %v1792_v37  ;;  %1652 = vmatprep.subr.mxu0 %v1792_v37 }
  0xd5   :  { %v1508_v45 = vpop.f32.mrf.mxu0  ;;  %v1529_v46 = vpop.f32.mrf.mxu1 }
  0xd6   :  { %v211_v5 = vadd.f32 %v1529_v46, %v1508_v45  ;;  %v1325_v46 = vld [vmem:[%s2365_s3 + $0x158] sm:$0xff] }
  0xd7   :  { %v124_v47 = vpop.f32.mrf.mxu0  ;;  %v205_v48 = vpop.f32.mrf.mxu1 }
  0xd8   :  { %v206_v63 = vadd.f32 %v205_v48, %v124_v47  ;;  %v1316_v47 = vld [vmem:[%s2365_s3 + $0x118] sm:$0xff]  ;;  %v1324_v48 = vld [vmem:[%s2365_s3 + $0x150] sm:$0xff] }
  0xe8   :  { %v1550_v49 = vpop.f32.mrf.mxu0 }
  0xe9   :  { %v306_v8 = vadd.f32 %v1550_v49, %v211_v5  ;;  %v1315_v49 = vld [vmem:[%s2365_s3 + $0x110] sm:$0xff]  ;;  %v1332_v5 = vld [vmem:[%s2365_s3 + $0x188] sm:$0xff] }
  0xea   :  { %v1571_v50 = vpop.f32.mrf.mxu1  ;;  %v296_v55 = vpop.f32.mrf.mxu0 }
  0xeb   :  { %v305_v3 = vadd.f32 %v296_v55, %v206_v63  ;;  %v1313_v55 = vld [vmem:[%s2365_s3 + $0x100] sm:$0xff] }
  0xec   :  { %v373_v56 = vpop.f32.mrf.mxu1  ;;  %v1335_v63 = vld [vmem:[%s2365_s3 + $0x1a0] sm:$0xff] }
  0xfd   :  { %v1592_v59 = vpop.f32.mrf.mxu0  ;;  %v1613_v60 = vpop.f32.mrf.mxu1 }
  0xfe   :  { %v454_v0 = vadd.f32 %v1592_v59, %v1571_v50  ;;  %v1337_v59 = vld [vmem:[%s2365_s3 + $0x1b0] sm:$0xff] }
  0xff   :  { %v448_v62 = vpop.f32.mrf.mxu0  ;;  %v529_v2 = vpop.f32.mrf.mxu1 }
 0x100   :  { %v449_v1 = vadd.f32 %v448_v62, %v373_v56  ;;  %v539_v6 = vadd.f32 %v1613_v60, %v454_v0  ;;  %v1347_v56 = vld [vmem:[%s2365_s3 + $0x1f8] sm:$0xff]  ;;  %v1345_v60 = vld [vmem:[%s2365_s3 + $0x1e8] sm:$0xff]  ;;  %v1344_v62 = vld [vmem:[%s2365_s3 + $0x1e0] sm:$0xff] }
 0x101   :  { %v1343_v0 = vld [vmem:[%s2365_s3 + $0x1d8] sm:$0xff] }
 0x102   :  { %v538_v4 = vadd.f32 %v529_v2, %v449_v1  ;;  %v2129_v9 = vmax.f32 %v306_v8, %v539_v6  ;;  %v1334_v1 = vld [vmem:[%s2365_s3 + $0x198] sm:$0xff]  ;;  %v1342_v2 = vld [vmem:[%s2365_s3 + $0x1d0] sm:$0xff]  ;;  %v1340_v6 = vld [vmem:[%s2365_s3 + $0x1c0] sm:$0xff] }
 0x103   :  { %v1331_v8 = vld [vmem:[%s2365_s3 + $0x180] sm:$0xff] }
 0x104   :  { %v540_v7 = vmax.f32 %v305_v3, %v538_v4  ;;  %v1333_v3 = vld [vmem:[%s2365_s3 + $0x190] sm:$0xff]  ;;  %v1341_v4 = vld [vmem:[%s2365_s3 + $0x1c8] sm:$0xff] }
 0x106   :  { %544 = vrot.lane.b32.xlu0 %v540_v7, %s1794_s16 }
 0x10a   :  { %546 = vrot.lane.b32.xlu0 %v2129_v9, %s1794_s16 }
 0x178   :  { %v545_v11 = vpop.permute.xlu0 %544 }
 0x179   :  { %v550_v12 = vmax.f32 %v540_v7, %v545_v11 }
 0x17b   :  { %v559_v13 = vadd.f32 %v2135_v10, %v550_v12 }
 0x17c   :  { %v547_v35 = vpop.permute.xlu0 %546 }
 0x17d   :  { %v561_v14 = vmax.f32 %v559_v13, 0.0  ;;  %v551_v40 = vmax.f32 %v2129_v9, %v547_v35 }
 0x17f   :  { %v581_v16 = vrot.slane %v561_v14, 2  ;;  %1650 = vmatmul.mubr.msk.f32.vlgmr.msra.gmra.mxu1 %vm582_vm2, %v561_v14  ;;  %v819_v31 = vrot.slane %v561_v14, 6  ;;  %v736_v34 = vrot.slane %v561_v14, 4  ;;  %v560_v45 = vadd.f32 %v2135_v10, %v551_v40 }
 0x180   :  { %1672 = vmatpush3.msra.mxu1 %v1311_v15  ;;  %1687 = vmatprep.mubr.msk.f32.mxu1 %vm1793_vm1, %v1792_v37 }
 0x181   :  { %1673 = vmatprep.subr.mxu1 %v1792_v37  ;;  %1631 = vmatmul.mubr.msk.f32.vlgmr.msra.gmra.mxu0 %vm582_vm2, %v581_v16  ;;  %v2256_v50 = vmax.f32 %v560_v45, 0.0 }
 0x182   :  { %1653 = vmatpush3.msra.mxu0 %v1302_v17  ;;  %1674 = vmatpush3.msra.mxu1 %v1310_v18 }
 0x183   :  { %1654 = vmatprep.subr.mxu0 %v1792_v37  ;;  %1675 = vmatprep.subr.mxu1 %v1792_v37  ;;  %v985_v54 = vrot.slane %v2256_v50, 2  ;;  %v1151_v7 = vrot.slane %v2256_v50, 6  ;;  %v1068_v9 = vrot.slane %v2256_v50, 4 }
 0x184   :  { %1655 = vmatpush3.msra.mxu0 %v1301_v19  ;;  %1676 = vmatpush3.msra.mxu1 %v1309_v20 }
 0x185   :  { %1656 = vmatprep.subr.mxu0 %v1792_v37  ;;  %1677 = vmatprep.subr.mxu1 %v1792_v37 }
 0x186   :  { %1657 = vmatpush3.msra.mxu0 %v1300_v21  ;;  %1678 = vmatpush3.msra.mxu1 %v1308_v22 }
 0x187   :  { %1658 = vmatprep.subr.mxu0 %v1792_v37  ;;  %1679 = vmatprep.subr.mxu1 %v1792_v37 }
 0x188   :  { %1659 = vmatpush3.msra.mxu0 %v1299_v23  ;;  %1680 = vmatpush3.msra.mxu1 %v1307_v24 }
 0x189   :  { %1660 = vmatprep.subr.mxu0 %v1792_v37  ;;  %1681 = vmatprep.subr.mxu1 %v1792_v37 }
 0x18a   :  { %1661 = vmatpush3.msra.mxu0 %v1298_v25  ;;  %1682 = vmatpush3.msra.mxu1 %v1306_v26 }
 0x18b   :  { %1662 = vmatprep.subr.mxu0 %v1792_v37  ;;  %1683 = vmatprep.subr.mxu1 %v1792_v37 }
 0x18c   :  { %1663 = vmatpush3.msra.mxu0 %v1297_v27  ;;  %1684 = vmatpush3.msra.mxu1 %v1305_v28 }
 0x18d   :  { %1664 = vmatprep.subr.mxu0 %v1792_v37  ;;  %1685 = vmatprep.subr.mxu1 %v1792_v37 }
 0x18e   :  { %1665 = vmatpush3.msra.mxu0 %v1296_v29  ;;  %1686 = vmatpush3.msra.mxu1 %v1304_v30 }
 0x18f   :  { %1666 = vmatprep.subr.mxu0 %v1792_v37  ;;  %1688 = vmatmul.mubr.msk.f32.vlgmr.msra.gmra.mxu1 %vm582_vm2, %v819_v31  ;;  %v1349_v31 = vld [vmem:[%s2366_s4] ss:$0 sm:$0xff] }
 0x190   :  { %1709 = vmatprep.subr.mxu1 %v1792_v37  ;;  %1667 = vmatpush3.msra.mxu0 %v1295_v32 }
 0x191   :  { %1668 = vmatprep.mubr.msk.f32.mxu0 %vm1793_vm1, %v1792_v37  ;;  %1710 = vmatpush3.msra.mxu1 %v1329_v33 }
 0x192   :  { %1669 = vmatmul.mubr.msk.f32.vlgmr.msra.gmra.mxu0 %vm582_vm2, %v736_v34  ;;  %1690 = vmatprep.subr.mxu0 %v1792_v37 }
 0x193   :  { %1711 = vmatprep.subr.mxu1 %v1792_v37  ;;  %1691 = vmatpush3.msra.mxu0 %v1320_v36 }
 0x194   :  { %1712 = vmatpush3.msra.mxu1 %v1328_v38  ;;  %1692 = vmatprep.subr.mxu0 %v1792_v37 }
 0x195   :  { %1713 = vmatprep.subr.mxu1 %v1792_v37  ;;  %1693 = vmatpush3.msra.mxu0 %v1319_v39 }
 0x196   :  { %1714 = vmatpush3.msra.mxu1 %v1327_v41  ;;  %1694 = vmatprep.subr.mxu0 %v1792_v37 }
 0x197   :  { %1715 = vmatprep.subr.mxu1 %v1792_v37  ;;  %1695 = vmatpush3.msra.mxu0 %v1318_v42 }
 0x198   :  { %1716 = vmatpush3.msra.mxu1 %v1326_v43  ;;  %1696 = vmatprep.subr.mxu0 %v1792_v37 }
 0x199   :  { %1717 = vmatprep.subr.mxu1 %v1792_v37  ;;  %1697 = vmatpush3.msra.mxu0 %v1317_v44 }
 0x19a   :  { %1718 = vmatpush3.msra.mxu1 %v1325_v46  ;;  %1698 = vmatprep.subr.mxu0 %v1792_v37 }
 0x19b   :  { %1719 = vmatprep.subr.mxu1 %v1792_v37  ;;  %1699 = vmatpush3.msra.mxu0 %v1316_v47 }
 0x19c   :  { %1720 = vmatpush3.msra.mxu1 %v1324_v48  ;;  %1700 = vmatprep.subr.mxu0 %v1792_v37 }
 0x19d   :  { %1721 = vmatprep.subr.mxu1 %v1792_v37  ;;  %1701 = vmatpush3.msra.mxu0 %v1315_v49 }
 0x19e   :  { %1722 = vmatpush3.msra.mxu1 %v1323_v51  ;;  %1702 = vmatprep.subr.mxu0 %v1792_v37 }
 0x19f   :  { %1723 = vmatprep.subr.mxu1 %v1792_v37  ;;  %1703 = vmatpush3.msra.mxu0 %v1314_v52 }
 0x1a0   :  { %1724 = vmatpush3.msra.mxu1 %v1322_v53  ;;  %1725 = vmatprep.mubr.msk.f32.mxu1 %vm1793_vm1, %v1792_v37 }
 0x1a1   :  { %1704 = vmatprep.subr.mxu0 %v1792_v37  ;;  %1726 = vmatmul.mubr.msk.f32.vlgmr.msra.gmra.mxu1 %vm582_vm2, %v985_v54 }
 0x1a2   :  { %1747 = vmatprep.subr.mxu1 %v1792_v37  ;;  %1705 = vmatpush3.msra.mxu0 %v1313_v55 }
 0x1a3   :  { %1706 = vmatprep.mubr.msk.f32.mxu0 %vm1793_vm1, %v1792_v37  ;;  %1748 = vmatpush3.msra.mxu1 %v1347_v56 }
 0x1a4   :  { %1707 = vmatmul.mubr.msk.f32.vlgmr.msra.gmra.mxu0 %vm582_vm2, %v2256_v50  ;;  %1728 = vmatprep.subr.mxu0 %v1792_v37 }
 0x1a5   :  { %1749 = vmatprep.subr.mxu1 %v1792_v37  ;;  %1729 = vmatpush3.msra.mxu0 %v1338_v57 }
 0x1a6   :  { %1750 = vmatpush3.msra.mxu1 %v1346_v58  ;;  %1730 = vmatprep.subr.mxu0 %v1792_v37 }
 0x1a7   :  { %1751 = vmatprep.subr.mxu1 %v1792_v37  ;;  %1731 = vmatpush3.msra.mxu0 %v1337_v59 }
 0x1a8   :  { %1752 = vmatpush3.msra.mxu1 %v1345_v60  ;;  %1732 = vmatprep.subr.mxu0 %v1792_v37 }
 0x1a9   :  { %1753 = vmatprep.subr.mxu1 %v1792_v37  ;;  %1733 = vmatpush3.msra.mxu0 %v1336_v61 }
 0x1aa   :  { %1754 = vmatpush3.msra.mxu1 %v1344_v62  ;;  %1734 = vmatprep.subr.mxu0 %v1792_v37 }
 0x1ab   :  { %1755 = vmatprep.subr.mxu1 %v1792_v37  ;;  %1735 = vmatpush3.msra.mxu0 %v1335_v63 }
 0x1ac   :  { %1756 = vmatpush3.msra.mxu1 %v1343_v0  ;;  %1736 = vmatprep.subr.mxu0 %v1792_v37 }
 0x1ad   :  { %1757 = vmatprep.subr.mxu1 %v1792_v37  ;;  %1737 = vmatpush3.msra.mxu0 %v1334_v1 }
 0x1ae   :  { %1758 = vmatpush3.msra.mxu1 %v1342_v2  ;;  %1738 = vmatprep.subr.mxu0 %v1792_v37 }
 0x1af   :  { %1759 = vmatprep.subr.mxu1 %v1792_v37  ;;  %1739 = vmatpush3.msra.mxu0 %v1333_v3 }
 0x1b0   :  { %1760 = vmatpush3.msra.mxu1 %v1341_v4  ;;  %1740 = vmatprep.subr.mxu0 %v1792_v37 }
 0x1b1   :  { %1761 = vmatprep.subr.mxu1 %v1792_v37  ;;  %1741 = vmatpush3.msra.mxu0 %v1332_v5 }
 0x1b2   :  { %1762 = vmatpush3.msra.mxu1 %v1340_v6  ;;  %1763 = vmatprep.mubr.msk.f32.mxu1 %vm1793_vm1, %v1792_v37 }
 0x1b3   :  { %1742 = vmatprep.subr.mxu0 %v1792_v37  ;;  %1764 = vmatmul.mubr.msk.f32.vlgmr.msra.gmra.mxu1 %vm582_vm2, %v1151_v7 }
 0x1b4   :  { %1743 = vmatpush3.msra.mxu0 %v1331_v8  ;;  %1744 = vmatprep.mubr.msk.f32.mxu0 %vm1793_vm1, %v1792_v37 }
 0x1b5   :  { %1745 = vmatmul.mubr.msk.f32.vlgmr.msra.gmra.mxu0 %vm582_vm2, %v1068_v9 }
 0x23f   :  { %v723_v10 = vpop.f32.mrf.mxu1 }
 0x241   :  { %v651_v11 = vpop.f32.mrf.mxu0  ;;  %v1651_v12 = vpop.f32.mrf.mxu1 }
 0x242   :  { %v724_v22 = vadd.f32 %v723_v10, %v651_v11 }
 0x243   :  { %v1632_v13 = vpop.f32.mrf.mxu0 }
 0x24f   :  { %v888_v14 = vpop.f32.mrf.mxu1 }
 0x251   :  { %v1689_v15 = vpop.f32.mrf.mxu1 }
 0x252   :  { %v805_v16 = vpop.f32.mrf.mxu0 }
 0x253   :  { %v809_v23 = vadd.f32 %v805_v16, %v724_v22 }
 0x254   :  { %v1670_v17 = vpop.f32.mrf.mxu0 }
 0x255   :  { %v892_v24 = vadd.f32 %v888_v14, %v809_v23 }
 0x261   :  { %v1054_v18 = vpop.f32.mrf.mxu1 }
 0x263   :  { %v1727_v19 = vpop.f32.mrf.mxu1 }
 0x264   :  { %v971_v20 = vpop.f32.mrf.mxu0 }
 0x265   :  { %v975_v25 = vadd.f32 %v971_v20, %v892_v24 }
 0x266   :  { %v1708_v21 = vpop.f32.mrf.mxu0 }
 0x267   :  { %v1058_v37 = vadd.f32 %v1054_v18, %v975_v25 }
 0x273   :  { %v1220_v26 = vpop.f32.mrf.mxu1 }
 0x275   :  { %v1137_v27 = vpop.f32.mrf.mxu0  ;;  %v1765_v28 = vpop.f32.mrf.mxu1 }
 0x276   :  { %v1141_v29 = vadd.f32 %v1137_v27, %v1058_v37 }
 0x277   :  { %v1746_v30 = vpop.f32.mrf.mxu0 }
 0x278   :  { %v1224_v32 = vadd.f32 %v1220_v26, %v1141_v29 }
 0x27a   :  { %v1232_v33 = vadd.f32 %v1349_v31, %v1224_v32 }
 0x27c   :  { %1233 = vst [vmem:[#allocation2] sm:$0x3] %v1232_v33 }
 0x27d   :  { %1781 = shalt.err (!%p1778_p4)
}
 0x27e   :  { %1243 = dma.vmem_to_hbm [thread:$0]  %s1241_s7, 32, %s2367_s5, [#allocation3]  }
 0x27f   :  { %1790 = dma.done.wait [#allocation3], 32  }
 0x280   :  { %1791 = vsyncadd [#allocation3], 4294967264 }
 0x281   :  { %1247 = vsyncpa [#allocation3], 1 }

</bundles_post_ra>
